<compile_context>
chip_gen: v7x
topology: tpu7x:2x2x1
jax: 0.10.0
libtpu: 0.0.40
codegen_flags: <defaults>
</compile_context>

<pallas_src>
import functools

import jax
import jax.numpy as jnp
import numpy as np
from jax.experimental import pallas as pl
from jax.experimental.pallas import tpu as pltpu


def _mlp_kernel(x_ref, w1_ref, b1_ref, w2_ref, b2_ref, out_ref):
    """out = relu(x @ w1 + b1) @ w2 + b2  (bf16 MXU operands, f32 accumulate)."""
    x_bf = x_ref[...].astype(jnp.bfloat16)                     # VPU cast, hidden under MXU
    h = jnp.dot(x_bf, w1_ref[...], preferred_element_type=jnp.float32)
    h = jnp.maximum(h + b1_ref[...], 0.0)                      # bias + ReLU in f32 (VPU)
    out = jnp.dot(h.astype(jnp.bfloat16), w2_ref[...],
                  preferred_element_type=jnp.float32) + b2_ref[...]
    out_ref[...] = out.astype(out_ref.dtype)


def prepare_params(params):
    """One-time parameter prep (cache the result; do NOT call per forward).

    Weights -> bf16 (MXU-rate operands on v6e/v7x, halves weight DMA bytes),
    biases  -> f32, reshaped to (1, H) / (1, O) so they broadcast in-kernel.
    """
    w1, b1, w2, b2 = params
    return (jnp.asarray(w1, jnp.bfloat16),
            jnp.asarray(b1, jnp.float32).reshape(1, -1),
            jnp.asarray(w2, jnp.bfloat16),
            jnp.asarray(b2, jnp.float32).reshape(1, -1))


@functools.partial(jax.jit, static_argnames=("block_batch",))
def bayesian_nn_forward(x, prepared_params, *, block_batch=512):
    """x: (batch, input_dim) f32.  prepared_params from prepare_params().

    Returns (batch, output_dim) f32 == relu(x @ w1 + b1) @ w2 + b2.
    """
    w1, b1, w2, b2 = prepared_params
    batch, input_dim = x.shape
    hidden = w1.shape[1]
    output_dim = w2.shape[1]

    # Batch tile: full array if small (full dims always satisfy the (8,128)
    # rule); otherwise 512-row tiles (multiple of 8) pipelined against MXU.
    tb = batch if batch <= block_batch else block_batch
    grid = (pl.cdiv(batch, tb),)

    const_map = lambda i: (0, 0)   # weights/biases: DMA'd once, VMEM-resident

    flops = 2 * batch * (input_dim * hidden + hidden * output_dim)
    bytes_accessed = (x.size * x.dtype.itemsize
                      + w1.size * w1.dtype.itemsize + w2.size * w2.dtype.itemsize
                      + b1.size * b1.dtype.itemsize + b2.size * b2.dtype.itemsize
                      + batch * output_dim * 4)

    return pl.pallas_call(
        _mlp_kernel,
        out_shape=jax.ShapeDtypeStruct((batch, output_dim), jnp.float32),
        grid=grid,
        in_specs=[
            pl.BlockSpec((tb, input_dim), lambda i: (i, 0)),
            pl.BlockSpec((input_dim, hidden), const_map),
            pl.BlockSpec((1, hidden), const_map),
            pl.BlockSpec((hidden, output_dim), const_map),
            pl.BlockSpec((1, output_dim), const_map),
        ],
        out_specs=pl.BlockSpec((tb, output_dim), lambda i: (i, 0)),
        compiler_params=pltpu.CompilerParams(
            dimension_semantics=("parallel",)),   # 2 TCs on v7x; no-op on v5e/v6e
        cost_estimate=pl.CostEstimate(
            flops=flops, transcendentals=0, bytes_accessed=bytes_accessed),
    )(x, w1, b1, w2, b2)


def init_params(key, input_dim, hidden_dim, output_dim):
    """PyTorch nn.Linear-style init; weights stored (in, out)."""
    ks = jax.random.split(key, 4)

    def lin(k, fan_in, shape):
        bound = 1.0 / np.sqrt(fan_in)
        return jax.random.uniform(k, shape, jnp.float32, -bound, bound)

    w1 = lin(ks[0], input_dim, (input_dim, hidden_dim))
    b1 = lin(ks[1], input_dim, (hidden_dim,))
    w2 = lin(ks[2], hidden_dim, (hidden_dim, output_dim))
    b2 = lin(ks[3], hidden_dim, (output_dim,))
    return (w1, b1, w2, b2)


def reference_forward(x, prepared_params):
    """Pure-JAX reference mirroring the kernel's dtype path (bf16 ops, f32 acc)."""
    w1, b1, w2, b2 = prepared_params
    h = jnp.dot(x.astype(jnp.bfloat16), w1,
                preferred_element_type=jnp.float32) + b1
    h = jnp.maximum(h, 0.0)
    return jnp.dot(h.astype(jnp.bfloat16), w2,
                   preferred_element_type=jnp.float32) + b2


if __name__ == "__main__":
    batch, input_dim, hidden_dim, output_dim = 4, 16, 32, 8

    key = jax.random.PRNGKey(0)
    k_x, k_p = jax.random.split(key)
    x = jax.random.normal(k_x, (batch, input_dim), jnp.float32)

    raw_params = init_params(k_p, input_dim, hidden_dim, output_dim)
    params = prepare_params(raw_params)   # one-time prep, cached with the model

    out = bayesian_nn_forward(x, params)
    out = jax.block_until_ready(out)

    ref = reference_forward(x, params)
    np.testing.assert_allclose(np.asarray(out), np.asarray(ref),
                               rtol=1e-4, atol=1e-4)

    print("KERNEL_OK")
</pallas_src>

<mosaic_0001>
module attributes {stable_mosaic.version = 11 : i64} {
  func.func @_mlp_kernel(%arg0: i32, %arg1: memref<4x16xf32, #tpu.memory_space<vmem>>, %arg2: memref<16x32xbf16, #tpu.memory_space<vmem>>, %arg3: memref<1x32xf32, #tpu.memory_space<vmem>>, %arg4: memref<32x8xbf16, #tpu.memory_space<vmem>>, %arg5: memref<1x8xf32, #tpu.memory_space<vmem>>, %arg6: memref<4x8xf32, #tpu.memory_space<vmem>>) attributes {dimension_semantics = [#tpu.dimension_semantics<parallel>], iteration_bounds = array<i64: 1>, scalar_prefetch = 0 : i64, scratch_operands = 0 : i64, tpu.core_type = #tpu.core_type<tc>, window_params = [{transform_indices = @transform_0, window_bounds = array<i64: 4, 16>}, {pipeline_mode = #tpu.pipeline_mode<synchronous>, transform_indices = @transform_1, window_bounds = array<i64: 16, 32>}, {pipeline_mode = #tpu.pipeline_mode<synchronous>, transform_indices = @transform_2, window_bounds = array<i64: 1, 32>}, {pipeline_mode = #tpu.pipeline_mode<synchronous>, transform_indices = @transform_3, window_bounds = array<i64: 32, 8>}, {pipeline_mode = #tpu.pipeline_mode<synchronous>, transform_indices = @transform_4, window_bounds = array<i64: 1, 8>}, {transform_indices = @transform_5, window_bounds = array<i64: 4, 8>}]} {
    %c0 = arith.constant 0 : index
    %c0_0 = arith.constant 0 : index
    %0 = vector.load %arg1[%c0, %c0_0] : memref<4x16xf32, #tpu.memory_space<vmem>>, vector<4x16xf32>
    %1 = arith.truncf %0 : vector<4x16xf32> to vector<4x16xbf16>
    %c0_1 = arith.constant 0 : index
    %c0_2 = arith.constant 0 : index
    %2 = vector.load %arg2[%c0_1, %c0_2] : memref<16x32xbf16, #tpu.memory_space<vmem>>, vector<16x32xbf16>
    %cst = arith.constant dense<0.000000e+00> : vector<4x32xf32>
    %3 = tpu.matmul %1, %2, %cst {dimension_numbers = #tpu.dot_dimension_numbers<[1], [0], [0], [1], [0, 0, 1, 1], [], []>} : vector<4x16xbf16>, vector<16x32xbf16>, vector<4x32xf32> -> vector<4x32xf32>
    %c0_3 = arith.constant 0 : index
    %c0_4 = arith.constant 0 : index
    %4 = vector.load %arg3[%c0_3, %c0_4] : memref<1x32xf32, #tpu.memory_space<vmem>>, vector<1x32xf32>
    %5 = vector.broadcast %4 : vector<1x32xf32> to vector<4x32xf32>
    %6 = arith.addf %3, %5 : vector<4x32xf32>
    %cst_5 = arith.constant 0.000000e+00 : f32
    %7 = vector.broadcast %cst_5 : f32 to vector<4x32xf32>
    %8 = arith.maximumf %6, %7 : vector<4x32xf32>
    %9 = arith.truncf %8 : vector<4x32xf32> to vector<4x32xbf16>
    %c0_6 = arith.constant 0 : index
    %c0_7 = arith.constant 0 : index
    %10 = vector.load %arg4[%c0_6, %c0_7] : memref<32x8xbf16, #tpu.memory_space<vmem>>, vector<32x8xbf16>
    %cst_8 = arith.constant dense<0.000000e+00> : vector<4x8xf32>
    %11 = tpu.matmul %9, %10, %cst_8 {dimension_numbers = #tpu.dot_dimension_numbers<[1], [0], [0], [1], [0, 0, 1, 1], [], []>} : vector<4x32xbf16>, vector<32x8xbf16>, vector<4x8xf32> -> vector<4x8xf32>
    %c0_9 = arith.constant 0 : index
    %c0_10 = arith.constant 0 : index
    %12 = vector.load %arg5[%c0_9, %c0_10] : memref<1x8xf32, #tpu.memory_space<vmem>>, vector<1x8xf32>
    %13 = vector.broadcast %12 : vector<1x8xf32> to vector<4x8xf32>
    %14 = arith.addf %11, %13 : vector<4x8xf32>
    %c0_11 = arith.constant 0 : index
    %c0_12 = arith.constant 0 : index
    %15 = vector.load %arg6[%c0_11, %c0_12] : memref<4x8xf32, #tpu.memory_space<vmem>>, vector<4x8xf32>
    tpu.vector_store %arg6[%c0_11, %c0_12], %14 {strides = array<i32>} : memref<4x8xf32, #tpu.memory_space<vmem>>, vector<4x8xf32>,
    return
  }
  func.func @transform_0(%arg0: i32) -> (i32, i32) {
    %c0_i32 = arith.constant 0 : i32
    %c0_i32_0 = arith.constant 0 : i32
    return %arg0, %c0_i32 : i32, i32
  }
  func.func @transform_1(%arg0: i32) -> (i32, i32) {
    %c0_i32 = arith.constant 0 : i32
    %c0_i32_0 = arith.constant 0 : i32
    %c0_i32_1 = arith.constant 0 : i32
    return %c0_i32, %c0_i32_0 : i32, i32
  }
  func.func @transform_2(%arg0: i32) -> (i32, i32) {
    %c0_i32 = arith.constant 0 : i32
    %c0_i32_0 = arith.constant 0 : i32
    %c0_i32_1 = arith.constant 0 : i32
    return %c0_i32, %c0_i32_0 : i32, i32
  }
  func.func @transform_3(%arg0: i32) -> (i32, i32) {
    %c0_i32 = arith.constant 0 : i32
    %c0_i32_0 = arith.constant 0 : i32
    %c0_i32_1 = arith.constant 0 : i32
    return %c0_i32, %c0_i32_0 : i32, i32
  }
  func.func @transform_4(%arg0: i32) -> (i32, i32) {
    %c0_i32 = arith.constant 0 : i32
    %c0_i32_0 = arith.constant 0 : i32
    %c0_i32_1 = arith.constant 0 : i32
    return %c0_i32, %c0_i32_0 : i32, i32
  }
  func.func @transform_5(%arg0: i32) -> (i32, i32) {
    %c0_i32 = arith.constant 0 : i32
    %c0_i32_0 = arith.constant 0 : i32
    return %arg0, %c0_i32 : i32, i32
  }
}

</mosaic_0001>

<bundles_post_ra>
// kernel: bayesian_nn_forward.1
= control target key start
LH: loop header
LB: loop body
LE: loop exit
PB: predicated region body
PF: predicated region fallthrough
CT: control target
= control target key end

     0   :  { %v224_v1 = vmov 0.0   ;;  %vm39_vm0 = vcmask 130048   ;;  %vm225_vm1 = vmmov 0   ;;  %s287_s0 = inlined_call_operand.vmem [shape: f32[4,16], index: 0, kind: input, shape index: {}]   ;;  %s288_s1 = inlined_call_operand.vmem [shape: bf16[16,32], index: 1, kind: input, shape index: {}]   ;;  %s289_s2 = inlined_call_operand.vmem [shape: f32[1,32], index: 2, kind: input, shape index: {}]   ;;  %s290_s3 = inlined_call_operand.vmem [shape: bf16[32,8], index: 3, kind: input, shape index: {}]   ;;  %s291_s4 = inlined_call_operand.vmem [shape: f32[1,8], index: 4, kind: input, shape index: {}]   ;;  %s292_s5 = inlined_call_operand.hbm [shape: f32[4,8], index: 5, kind: output, shape index: {}]  }
   0x1   :  { %v197_v0 = vld [vmem:[%s288_s1] sm:$0xff]   ;;  %180 = vmatprep.subr.bf16.mxu0 %v224_v1  ;;  %186 = vmatprep.subr.bf16.mxu1 %v224_v1 }
   0x2   :  { %v22_v2 = vld [vmem:[%s287_s0] sm:$0xf]  ;;  %181 = vmatpush3.bf16.msra.mxu0 %v197_v0  ;;  %182 = vmatprep.mubr.msk.bf16.mxu0 %vm225_vm1, %v224_v1 }
   0x3   :  { %v23_v3 = vpack.c.bf16 %v22_v2, %v22_v2  ;;  %190 = vmatprep.mubr.msk.bf16.mxu1 %vm225_vm1, %v224_v1 }
   0x4   :  { %10 = vsyncpa [#allocation3], 0  ;;  %v198_v4 = vld [vmem:[%s290_s3] sm:$0xff]   ;;  %v199_v5 = vld [vmem:[%s290_s3 + $0x8] sm:$0xff]   ;;  %vm108_vm2 = vcmask 261120   ;;  %s226_s28 = smov [#allocation2]  }
   0x5   :  { %183 = vmatmul.mubr.msk.bf16.vlgmr.msra.gmra.mrb[0].mxu0 %vm39_vm0, %v23_v3  ;;  %187 = vmatpush3.bf16.msra.mxu1 %v198_v4  ;;  %v168_v6 = vld [vmem:[%s289_s2] ss:$0 sm:$0xff]  ;;  %s160_s3 = sshll.u32 %s226_s28, 4  ;;  %vm152_vm3 = vcmask 60416   ;;  %s161_s3 = int_to_ptr.vmem [resolvable:$true] %s160_s3 }
   0x6   :  { %188 = vmatprep.subr.bf16.mxu1 %v224_v1  ;;  %v171_v14 = vld [vmem:[%s291_s4] ss:$0 sm:$0xff]  ;;  %s200_s2 = scalar_lea.vmem %s161_s3, 64  ;;  %p205_p1 = scmp.lt.s32.totalorder %s161_s3, %s161_s3 }
   0x7   :  { %p201_p0 = scmp.ne.s32.totalorder %s161_s3, %s200_s2  ;;  %p206_p2 = scmp.lt.s32.totalorder %s200_s2, %s200_s2 }
   0x9   :  { %189 = vmatpush3.bf16.msra.mxu1 %v199_v5  ;;  %p207_p3 = por %p206_p2, %p205_p1 }
   0xb   :  { %p208_p4 = pnand %p207_p3, %p201_p0 }
  0xd8   :  { %v77_v7 = vpop.f32.mrb[0].mxu0 }
  0xd9   :  { %v78_v8 = vadd.f32 %v168_v6, %v77_v7  ;;  %v184_v9 = vpop.f32.mrb[1].mxu0 }
  0xda   :  { %v80_v10 = vpop.f32.mrb[2].mxu0 }
  0xdb   :  { %v83_v11 = vmax.f32 %v78_v8, 0.0  ;;  %v185_v12 = vpop.f32.mrb[3].mxu0 }
  0xdd   :  { %v84_v13 = vpack.c.bf16 %v83_v11, %v83_v11 }
  0xdf   :  { %191 = vmatmul.mubr.msk.bf16.vlgmr.msra.gmra.mrb[0].mxu1 %vm108_vm2, %v84_v13 }
 0x1b2   :  { %v146_v15 = vpop.f32.mrb[0].mxu1 }
 0x1b3   :  { %v147_v16 = vadd.f32 %v171_v14, %v146_v15  ;;  %v192_v17 = vpop.f32.mrb[1].mxu1 }
 0x1b4   :  { %v149_v18 = vpop.f32.mrb[2].mxu1 }
 0x1b5   :  { %v193_v19 = vpop.f32.mrb[3].mxu1  ;;  %153 = vst.msk [vmem:[#allocation2] sm:$0xf] %vm152_vm3, %v147_v16 }
 0x1b6   :  { %211 = shalt.err (!%p208_p4)
}
 0x1b7   :  { %s212_s4 = scalar_lea.hbm %s292_s5, 64 }
 0x1b8   :  { %p213_p5 = scmp.ne.s32.totalorder %s292_s5, %s212_s4  ;;  %p216_p6 = scmp.lt.u32.totalorder %s212_s4, %s292_s5 }
 0x1ba   :  { %p218_p7 = pnand %p216_p6, %p213_p5 }
 0x1bc   :  { %221 = shalt.err (!%p218_p7)
}
 0x1bd   :  { %163 = dma.vmem_to_hbm [thread:$0]  %s161_s3, 64, %s292_s5, [#allocation3]  }
 0x1be   :  { %222 = dma.done.wait [#allocation3], 64  }
 0x1bf   :  { %223 = vsyncadd [#allocation3], 4294967232 }
 0x1c0   :  { %167 = vsyncpa [#allocation3], 1 }

</bundles_post_ra>
